<compile_context>
chip_gen: v7x
topology: tpu7x:2x2x1
jax: 0.10.0
libtpu: 0.0.40
codegen_flags: <defaults>
</compile_context>

<pallas_src>
import jax
import jax.numpy as jnp
from jax.experimental import pallas as pl
from jax.experimental.pallas import tpu as pltpu

_LANES = 128
_MIB = 1024 * 1024


def _gemv_kernel(x_ref, w_ref, o_ref):
    # x_ref: (TB, Fp) packed activation tile (Fp = P*F, lane-dense when packed)
    # w_ref: (P, Fp)  block-diagonal weight rows, f32, resident across grid steps
    # o_ref: (P, TB)  lane-dense per-slot dot products, f32
    x = x_ref[...].astype(jnp.float32)
    w = w_ref[...]
    p = o_ref.shape[0]
    rows = []
    for k in range(p):  # p is a tiny static int (1 or 2) -> unrolled at trace time
        rows.append(jnp.sum(x * w[k:k + 1, :], axis=-1))  # VPU mul + XLU lane-reduce
    # TODO(synk): on v7x profile whether this XLU lane-reduce + (TB,)->(P,TB)
    # relayout is exposed beyond the per-tile DMA window; if so switch to a
    # segmented in-lane reduction that keeps partial sums in native layout.
    o_ref[...] = jnp.stack(rows, axis=0).astype(o_ref.dtype)


def _round_up(x, m):
    return ((x + m - 1) // m) * m


def dilated_net_forward(x, weight, *, bf16_activations=False,
                        min_pallas_batch=1024,
                        tile_budget_bytes=8 * _MIB):
    """x: (B, num_inputs, n_steps_past); weight: (1, F) in PyTorch nn.Linear layout."""
    B = x.shape[0]
    F = x.shape[1] * x.shape[2]
    orig_dtype = x.dtype

    x_flat = jnp.reshape(x, (B, F))                      # free: contiguous reshape
    w_row = jnp.reshape(weight, (1, F)).astype(jnp.float32)

    # Small-batch fallback: a fused XLA dot beats the pallas_call boundary here.
    if B < min_pallas_batch:
        out = jnp.dot(x_flat.astype(jnp.float32), w_row.T,
                      precision=jax.lax.Precision.HIGHEST)
        return out.astype(orig_dtype)

    # bf16 streaming is only a net win when activations are already bf16 upstream
    # (or the cast fuses into the producer); the kernel accumulates in f32 either way.
    act_dtype = jnp.bfloat16 if bf16_activations else x_flat.dtype
    x_act = x_flat.astype(act_dtype)

    # Pack narrow feature rows onto full 128-lane rows: (B, F) -> (B/P, P*F).
    if F <= _LANES and _LANES % F == 0 and B % (_LANES // F) == 0:
        p = _LANES // F
    else:
        p = 1
    fp = p * F
    rp = B // p
    x_packed = jnp.reshape(x_act, (rp, fp))              # free: contiguous reshape
    w_packed = jnp.kron(jnp.eye(p, dtype=jnp.float32), w_row)   # (P, P*F) block-diag

    # --- tile selection with corrected (lane-padded) VMEM accounting -------------
    itemsize = jnp.dtype(act_dtype).itemsize
    fp_padded = _round_up(fp, _LANES)                    # VMEM pads lanes to 128
    row_bytes = fp_padded * itemsize
    tb_max = max(_LANES, (tile_budget_bytes // row_bytes) // _LANES * _LANES)
    # Guarantee >=2 grid steps so the "parallel" axis feeds both v7x TensorCores.
    nt = max(2, pl.cdiv(rp, tb_max))
    tb = min(tb_max, _round_up(pl.cdiv(rp, nt), _LANES))
    nt = pl.cdiv(rp, tb)
    rp_pad = nt * tb

    cost = pl.CostEstimate(flops=2 * B * F,
                           transcendentals=0,
                           bytes_accessed=B * F * itemsize + B * 4 + F * 4)

    out_rows = pl.pallas_call(
        _gemv_kernel,
        out_shape=jax.ShapeDtypeStruct((p, rp_pad), jnp.float32),
        grid=(nt,),
        in_specs=[
            pl.BlockSpec((tb, fp), lambda i: (i, 0)),    # stream packed batch tiles
            pl.BlockSpec((p, fp), lambda i: (0, 0)),     # weight resident across steps
        ],
        out_specs=pl.BlockSpec((p, tb), lambda i: (0, i)),   # lane-dense output slab
        compiler_params=pltpu.CompilerParams(
            dimension_semantics=("parallel",),           # shard batch tiles across TCs
            vmem_limit_bytes=32 * _MIB,                  # safe on v5e/v6e/v7x
        ),
        cost_estimate=cost,
    )(x_packed, w_packed)

    # out_rows[k, i] is the result for batch element i*P + k -> interleave to (B, 1).
    out = jnp.transpose(out_rows[:, :rp]).reshape(B, 1)
    return out.astype(orig_dtype)


if __name__ == "__main__":
    n_steps_past = 16
    num_inputs = 4
    F = n_steps_past * num_inputs

    key = jax.random.PRNGKey(0)
    kw, k1, k2, k3 = jax.random.split(key, 4)

    # Deterministic init (shape matches nn.Linear(F, 1, bias=False).weight).
    bound = 1.0 / (F ** 0.5)
    weight = jax.random.uniform(kw, (1, F), dtype=jnp.float32,
                                minval=-bound, maxval=bound)

    def ref(xa):
        flat = jnp.reshape(xa, (xa.shape[0], F)).astype(jnp.float32)
        return jnp.dot(flat, weight.T, precision=jax.lax.Precision.HIGHEST)

    # 1) Module-default small shape (batch=2, n_stocks=4, T=16): fallback path.
    x_small = jax.random.normal(k1, (2, num_inputs, n_steps_past), dtype=jnp.float32)
    out_small = jax.block_until_ready(dilated_net_forward(x_small, weight))
    assert out_small.shape == (2, 1)
    assert jnp.allclose(out_small, ref(x_small), atol=1e-5, rtol=1e-5)

    # 2) Small forced-Pallas run: packed (B,64)->(B/2,128) path, two grid steps.
    x_mid = jax.random.normal(k2, (512, num_inputs, n_steps_past), dtype=jnp.float32)
    out_mid = jax.block_until_ready(
        dilated_net_forward(x_mid, weight, min_pallas_batch=0))
    assert out_mid.shape == (512, 1)
    assert jnp.allclose(out_mid, ref(x_mid), atol=1e-4, rtol=1e-4)

    # 3) Larger batch: default path, multi-tile pipeline with a ragged last tile.
    B3 = 12000
    x_big = jax.random.normal(k3, (B3, num_inputs, n_steps_past), dtype=jnp.float32)
    out_big = jax.block_until_ready(dilated_net_forward(x_big, weight))
    assert out_big.shape == (B3, 1)
    assert jnp.allclose(out_big, ref(x_big), atol=1e-4, rtol=1e-4)

    # 3b) Odd batch: exercises the unpacked (P=1) layout + ragged handling.
    x_odd = x_big[:4097]
    out_odd = jax.block_until_ready(
        dilated_net_forward(x_odd, weight, min_pallas_batch=0))
    assert out_odd.shape == (4097, 1)
    assert jnp.allclose(out_odd, ref(x_odd), atol=1e-4, rtol=1e-4)

    # 4) bf16 activation streaming; output stays f32 (accumulation precision kept).
    out_bf16 = jax.block_until_ready(
        dilated_net_forward(x_big, weight, bf16_activations=True))
    ref_bf16 = jnp.dot(
        jnp.reshape(x_big, (B3, F)).astype(jnp.bfloat16).astype(jnp.float32),
        weight.T, precision=jax.lax.Precision.HIGHEST)
    assert out_bf16.dtype == jnp.float32
    assert jnp.allclose(out_bf16, ref_bf16, atol=2e-3, rtol=2e-3)

    print("KERNEL_OK")
</pallas_src>

<mosaic_0001>
module attributes {stable_mosaic.version = 11 : i64} {
  func.func @_gemv_kernel(%arg0: i32, %arg1: memref<128x128xf32, #tpu.memory_space<vmem>>, %arg2: memref<2x128xf32, #tpu.memory_space<vmem>>, %arg3: memref<2x128xf32, #tpu.memory_space<vmem>>) attributes {dimension_semantics = [#tpu.dimension_semantics<parallel>], iteration_bounds = array<i64: 2>, scalar_prefetch = 0 : i64, scratch_operands = 0 : i64, tpu.core_type = #tpu.core_type<tc>, window_params = [{transform_indices = @transform_0, window_bounds = array<i64: 128, 128>}, {pipeline_mode = #tpu.pipeline_mode<synchronous>, transform_indices = @transform_1, window_bounds = array<i64: 2, 128>}, {transform_indices = @transform_2, window_bounds = array<i64: 2, 128>}]} {
    %c0 = arith.constant 0 : index
    %c0_0 = arith.constant 0 : index
    %0 = vector.load %arg1[%c0, %c0_0] : memref<128x128xf32, #tpu.memory_space<vmem>>, vector<128x128xf32>
    %c0_1 = arith.constant 0 : index
    %c0_2 = arith.constant 0 : index
    %1 = vector.load %arg2[%c0_1, %c0_2] : memref<2x128xf32, #tpu.memory_space<vmem>>, vector<2x128xf32>
    %2 = vector.extract_strided_slice %1 {offsets = [0, 0], sizes = [1, 128], strides = [1, 1]} : vector<2x128xf32> to vector<1x128xf32>
    %3 = vector.broadcast %2 : vector<1x128xf32> to vector<128x128xf32>
    %4 = arith.mulf %0, %3 : vector<128x128xf32>
    %cst = arith.constant dense<0.000000e+00> : vector<128xf32>
    %5 = vector.multi_reduction <add>, %4, %cst [1] : vector<128x128xf32> to vector<128xf32>
    %6 = vector.extract_strided_slice %1 {offsets = [1, 0], sizes = [1, 128], strides = [1, 1]} : vector<2x128xf32> to vector<1x128xf32>
    %7 = vector.broadcast %6 : vector<1x128xf32> to vector<128x128xf32>
    %8 = arith.mulf %0, %7 : vector<128x128xf32>
    %cst_3 = arith.constant dense<0.000000e+00> : vector<128xf32>
    %9 = vector.multi_reduction <add>, %8, %cst_3 [1] : vector<128x128xf32> to vector<128xf32>
    %10 = vector.shape_cast %5 : vector<128xf32> to vector<1x128xf32>
    %11 = vector.shape_cast %9 : vector<128xf32> to vector<1x128xf32>
    %12 = tpu.concatenate %10, %11 in 0 : vector<1x128xf32>, vector<1x128xf32> -> vector<2x128xf32>
    %c0_4 = arith.constant 0 : index
    %c0_5 = arith.constant 0 : index
    %13 = vector.load %arg3[%c0_4, %c0_5] : memref<2x128xf32, #tpu.memory_space<vmem>>, vector<2x128xf32>
    tpu.vector_store %arg3[%c0_4, %c0_5], %12 {strides = array<i32>} : memref<2x128xf32, #tpu.memory_space<vmem>>, vector<2x128xf32>,
    return
  }
  func.func @transform_0(%arg0: i32) -> (i32, i32) {
    %c0_i32 = arith.constant 0 : i32
    %c0_i32_0 = arith.constant 0 : i32
    return %arg0, %c0_i32 : i32, i32
  }
  func.func @transform_1(%arg0: i32) -> (i32, i32) {
    %c0_i32 = arith.constant 0 : i32
    %c0_i32_0 = arith.constant 0 : i32
    %c0_i32_1 = arith.constant 0 : i32
    return %c0_i32, %c0_i32_0 : i32, i32
  }
  func.func @transform_2(%arg0: i32) -> (i32, i32) {
    %c0_i32 = arith.constant 0 : i32
    %c0_i32_0 = arith.constant 0 : i32
    return %c0_i32, %arg0 : i32, i32
  }
}

</mosaic_0001>

<bundles_post_ra>
// kernel: tpu_custom_call.1
= control target key start
LH: loop header
LB: loop body
LE: loop exit
PB: predicated region body
PF: predicated region fallthrough
CT: control target
= control target key end

     0   :  { %7 = vsyncpa [#allocation3], 0  ;;  %s1144_s0 = inlined_call_operand.hbm [shape: f32[256,128], index: 0, kind: input, shape index: {}]   ;;  %s1145_s1 = inlined_call_operand.vmem [shape: f32[2,128], index: 1, kind: input, shape index: {}]   ;;  %s1146_s2 = inlined_call_operand.hbm [shape: f32[2,256], index: 2, kind: output, shape index: {}]  }
   0x1   :  { %9 = vsyncpa [#allocation3 + $0x1], 0 }
   0x2   :  { %10 = vsyncpa [#allocation4], 0 }
   0x3   :  { %12 = vsyncpa [#allocation4 + $0x1], 0  ;;  %s774_s9 = smov 0   ;;  %s776_s10 = smov 0  }
   0x4   :  { %s778_s11 = smov 0   ;;  %s780_s12 = smov 0  }
   0x5 LB: > { %s795_s13 = sadd.s32 4294967295, %s753_s12   ;;  %s595_s14 = sadd.s32 4294967294, %s753_s12   ;;  %s753_s12 = sphi %s780_s12, %s1159_s12   ;;  %s749_s11 = sphi %s778_s11, %s1158_s11   ;;  %s745_s10 = sphi %s776_s10, %s1157_s10   ;;  %s741_s9 = sphi %s774_s9, %s1156_s9  }
   0x6   : > { %s799_s15 = sadd.s32 1, %s753_s12   ;;  %s25_s16 = sadd.s32 1, %s749_s11 }
   0x7   : > { %s22_s17 = ssub.s32 %s753_s12, %s799_s15  ;;  %p32_p0 = scmp.ne.s32.totalorder %s749_s11, %s745_s10 }
   0x8   : > { %p23_p1 = scmp.eq.s32.totalorder %s22_s17, 0  ;;  %p33_p2 = scmp.eq.s32.totalorder %s753_s12, 0 }
   0x9   : > { %p38_p3 = scmp.ne.s32.totalorder %s745_s10, %s741_s9  ;;  %p39_p4 = scmp.eq.s32.totalorder %s795_s13, 0 }
   0xa   : > { %s811_s18 = scalar_select %p23_p1, %s749_s11, %s25_s16  }
   0xb   : > { %p813_p5 = por %p33_p2, %p32_p0  ;;  %p817_p6 = por %p39_p4, %p38_p3 }
   0xc   : > { %p83_p7 = scmp.eq.s32.totalorder %s795_s13, 1  ;;  %p89_p8 = scmp.eq.s32.totalorder %s595_s14, 1 }
   0xd   : > { %p621_p10 = scmp.lt.s32.totalorder %s753_s12, 2  ;;  %s112_s23 = sand.u32 1, %s749_s11  }
   0xe   : > { %p824_p11 = por %p83_p7, %p32_p0  ;;  %p828_p12 = por %p89_p8, %p38_p3 }
   0xf   : > { %s608_s24 = sshll.u32 %s753_s12, 11  ;;  %s598_s25 = sshll.u32 %s112_s23, 7 }
  0x10   : > { %s1150_s21 = scalar_select %p824_p11, 1, 0 }
  0x11   : > { %s1151_s22 = scalar_select %p828_p12, 1, 0 }
  0x12   : > { %s837_s28 = scalar_lea.hbm %s1144_s0, %s608_s24  ;;  %s116_s29 = scalar_lea.vmem [#allocation2], %s598_s25 }
  0x13   : > { %s123_s30 = sshll.u32 %s116_s29, 4  ;;  %p841_p13 = pnand %p621_p10, %p813_p5  ;;  %s845_s30 = int_to_ptr.vmem [resolvable:$true] %s123_s30 }
  0x14   : > { %s847_s4 = scalar_lea.sflag [#allocation3], %s112_s23  ;;  %s657_s5 = scalar_lea.hbm %s837_s28, 2048 }
  0x15   : > { %p658_p0 = scmp.ne.s32.totalorder %s837_s28, %s657_s5  ;;  %p659_p1 = pneg %p841_p13 }
  0x16   : > { %s662_s8 = scalar_lea.hbm %s1144_s0, 4096  ;;  %p663_p4 = scmp.lt.u32.totalorder %s837_s28, %s1144_s0 }
  0x17   : > { %p660_p2 = pnand %p659_p1, %p658_p0  ;;  %p664_p5 = scmp.lt.u32.totalorder %s662_s8, %s657_s5 }
  0x18   : > { %p666_p8 = scmp.lt.u32.totalorder %s657_s5, %s837_s28 }
  0x19   : > { %p661_p3 = pneg %p660_p2  ;;  %p665_p7 = por %p664_p5, %p663_p4 }
  0x1b   : > { %p667_p10 = por %p666_p8, %p665_p7 }
  0x1d   : > { %p668_p9 = pnand %p667_p10, %p661_p3 }
  0x1f   : > { %671 = shalt.err (!%p668_p9)
}
  0x20   : > { %s672_s17 = scalar_lea.vmem %s845_s30, 2048  ;;  %s755_s19 = smov [#allocation2]  }
  0x21   : > { %p673_p0 = scmp.ne.s32.totalorder %s845_s30, %s672_s17  ;;  %s677_s23 = sshll.u32 %s755_s19, 4  ;;  %s678_s23 = int_to_ptr.vmem [resolvable:$false] %s677_s23 }
  0x22   : > { %s679_s24 = scalar_lea.vmem %s678_s23, 4096  ;;  %p680_p11 = scmp.lt.s32.totalorder %s845_s30, %s678_s23 }
  0x23   : > { %p675_p2 = pnand %p673_p0, %p659_p1  ;;  %p681_p4 = scmp.lt.s32.totalorder %s679_s24, %s672_s17 }
  0x25   : > { %p676_p12 = pneg %p675_p2  ;;  %p682_p5 = por %p681_p4, %p680_p11 }
  0x27   : > { %p683_p7 = pnand %p682_p5, %p676_p12 }
  0x29   : > { %686 = shalt.err (!%p683_p7)
}
  0x2a   : > { %s756_s25 = smov 128   ;;  %s757_s26 = smov 8  }
  0x2b   : > { %616 = dma.hbm_to_vmem [thread:$0]  (!%p841_p13), %s837_s28, 2048, %s845_s30, %s847_s4, %s756_s25, %s756_s25, %s757_s26  }
  0x2c   : > { %p601_p9 = scmp.ge.s32.totalorder %s753_s12, 1  ;;  %p131_p1 = scmp.lt.s32.totalorder %s753_s12, 3 }
  0x2e   : > { %p132_p3 = pnand %p601_p9, %p131_p1 }
  0x2f   : > { %s878_s27 = sand.u32 (!%p132_p3), 1, %s745_s10  }
  0x30   : > { %135 = sbr.rel (%p132_p3) target bundleno = 286 (0x11e), region = 28  ;;  %s602_s29 = sshll.u32 (!%p132_p3), %s878_s27, 7 }
  0x31   : > { %s138_s5 = scalar_lea.sflag (!%p132_p3), [#allocation3], %s878_s27  ;;  %s882_s6 = scalar_lea.vmem (!%p132_p3), [#allocation2], %s602_s29 }
  0x37   : > { %732 = dma.done.wait (%p817_p6), %s138_s5, 2048  }
  0x38   : > { %734 = vsyncadd (%p817_p6), %s138_s5, 4294965248  ;;  %v180_v0 = vlaneseq  ;;  %v163_v4 = vld [vmem:[%s882_s6] sm:$0xff]  ;;  %v164_v8 = vld [vmem:[%s882_s6 + $0x8] sm:$0xff]  ;;  %vm311_vm0 = vcmask 130112   ;;  %vm318_vm1 = vcmask 195712   ;;  %vm325_vm2 = vcmask 261312  }
  0x39   : > { %v179_v5 = vld [vmem:[%s1145_s1] sm:$0x3]  ;;  %v165_v13 = vld [vmem:[%s882_s6 + $0x10] sm:$0xff]  ;;  %v166_v16 = vld [vmem:[%s882_s6 + $0x18] sm:$0xff]  ;;  %vm332_vm3 = vcmask 326912   ;;  %vm339_vm4 = vcmask 392512  }
  0x3a   : > { %v889_v1 = vshrl.u32 %v180_v0, 7  ;;  %v167_v19 = vld [vmem:[%s882_s6 + $0x20] sm:$0xff]  ;;  %v168_v22 = vld [vmem:[%s882_s6 + $0x28] sm:$0xff]  ;;  %v169_v25 = vld [vmem:[%s882_s6 + $0x30] sm:$0xff]  ;;  %vm346_vm5 = vcmask 458112   ;;  %vm353_vm6 = vcmask 523712  }
  0x3b   : > { %v170_v28 = vld [vmem:[%s882_s6 + $0x38] sm:$0xff]  ;;  %v171_v31 = vld [vmem:[%s882_s6 + $0x40] sm:$0xff]  ;;  %v172_v34 = vld [vmem:[%s882_s6 + $0x48] sm:$0xff]  ;;  %vm360_vm7 = vcmask 589312   ;;  %vm367_vm8 = vcmask 654912   ;;  %vm374_vm9 = vcmask 720512  }
  0x3c   : > { %v234_v2 = vsub.s32 1, %v889_v1  ;;  %v182_v3 = vsub.s32 0, %v889_v1  ;;  %v173_v37 = vld [vmem:[%s882_s6 + $0x50] sm:$0xff]  ;;  %v174_v40 = vld [vmem:[%s882_s6 + $0x58] sm:$0xff]  ;;  %v175_v43 = vld [vmem:[%s882_s6 + $0x60] sm:$0xff]  ;;  %vm381_vm10 = vcmask 786112  }
  0x3d   : > { %v176_v46 = vld [vmem:[%s882_s6 + $0x68] sm:$0xff]  ;;  %v177_v49 = vld [vmem:[%s882_s6 + $0x70] sm:$0xff]  ;;  %v178_v52 = vld [vmem:[%s882_s6 + $0x78] sm:$0xff]  ;;  %vm388_vm11 = vcmask 851712   ;;  %vm395_vm12 = vcmask 917312   ;;  %s603_s20 = sshll.u32 %s878_s27, 1 }
  0x3e   : > { %v897_v6 = vrot.slane %v179_v5, %v234_v2  ;;  %v899_v7 = vrot.slane %v179_v5, %v182_v3  ;;  %vm402_vm13 = vcmask 982912   ;;  %vm409_vm14 = vcmask 1048512   ;;  %s605_s3 = sshll.u32 %s795_s13, 5  ;;  %s161_s4 = scalar_lea.vmem [#allocation5], %s603_s20 }
  0x3f   : > { %vm508_vm15 = vcmask 1040384   ;;  %s525_s7 = sshll.u32 %s161_s4, 4  ;;  %s1100_s16 = scalar_lea.hbm %s1146_s2, %s605_s3  ;;  %s1102_s7 = int_to_ptr.vmem [resolvable:$true] %s525_s7 }
  0x40   : > { %v236_v9 = vmul.f32 %v897_v6, %v163_v4  ;;  %v184_v10 = vmul.f32 %v899_v7, %v163_v4  ;;  %v237_v11 = vmul.f32 %v897_v6, %v164_v8  ;;  %v185_v12 = vmul.f32 %v899_v7, %v164_v8  ;;  %s512_s13 = scalar_lea.sflag [#allocation4], %s878_s27  ;;  %s687_s17 = scalar_lea.vmem %s1102_s7, 32 }
  0x41   : > { %v238_v14 = vmul.f32 %v897_v6, %v165_v13  ;;  %v186_v15 = vmul.f32 %v899_v7, %v165_v13  ;;  %v239_v17 = vmul.f32 %v897_v6, %v166_v16  ;;  %v187_v18 = vmul.f32 %v899_v7, %v166_v16  ;;  %p688_p6 = scmp.ne.s32.totalorder %s1102_s7, %s687_s17  ;;  %p1153_p11 = scmp.ne.s32.totalorder %s1150_s21, 0 }
  0x42   : > { %252 = vadd.xlane.f32.xlu1 %v236_v9  ;;  %200 = vadd.xlane.f32.xlu0 %v184_v10  ;;  %v240_v20 = vmul.f32 %v897_v6, %v167_v19  ;;  %v188_v21 = vmul.f32 %v899_v7, %v167_v19  ;;  %v241_v23 = vmul.f32 %v897_v6, %v168_v22  ;;  %s758_s19 = smov [#allocation5]  }
  0x43   : > { %v189_v24 = vmul.f32 %v899_v7, %v168_v22  ;;  %v242_v26 = vmul.f32 %v897_v6, %v169_v25  ;;  %v190_v27 = vmul.f32 %v899_v7, %v169_v25  ;;  %v243_v29 = vmul.f32 %v897_v6, %v170_v28  ;;  %p689_p12 = pnand %p688_p6, %p1153_p11  ;;  %s691_s23 = sshll.u32 %s758_s19, 4  ;;  %s692_s23 = int_to_ptr.vmem [resolvable:$false] %s691_s23 }
  0x44   : > { %v191_v30 = vmul.f32 %v899_v7, %v170_v28  ;;  %v244_v32 = vmul.f32 %v897_v6, %v171_v31  ;;  %v192_v33 = vmul.f32 %v899_v7, %v171_v31  ;;  %v245_v35 = vmul.f32 %v897_v6, %v172_v34  ;;  %s693_s24 = scalar_lea.vmem %s692_s23, 64  ;;  %p694_p8 = scmp.lt.s32.totalorder %s1102_s7, %s692_s23 }
  0x45   : > { %v193_v36 = vmul.f32 %v899_v7, %v172_v34  ;;  %v246_v38 = vmul.f32 %v897_v6, %v173_v37  ;;  %v194_v39 = vmul.f32 %v899_v7, %v173_v37  ;;  %v247_v41 = vmul.f32 %v897_v6, %v174_v40  ;;  %p690_p13 = pneg %p689_p12  ;;  %p695_p10 = scmp.lt.s32.totalorder %s693_s24, %s687_s17 }
  0x46   : > { %254 = vadd.xlane.f32.xlu1 %v237_v11  ;;  %202 = vadd.xlane.f32.xlu0 %v185_v12  ;;  %v195_v42 = vmul.f32 %v899_v7, %v174_v40  ;;  %v248_v44 = vmul.f32 %v897_v6, %v175_v43  ;;  %v196_v45 = vmul.f32 %v899_v7, %v175_v43  ;;  %v301_v11 = vand.u32 127, %v180_v0 }
  0x47   : > { %v249_v47 = vmul.f32 %v897_v6, %v176_v46  ;;  %v197_v48 = vmul.f32 %v899_v7, %v176_v46  ;;  %v250_v50 = vmul.f32 %v897_v6, %v177_v49  ;;  %v198_v51 = vmul.f32 %v899_v7, %v177_v49  ;;  %p696_p0 = por %p695_p10, %p694_p8 }
  0x48   : > { %v251_v53 = vmul.f32 %v897_v6, %v178_v52  ;;  %v199_v54 = vmul.f32 %v899_v7, %v178_v52  ;;  %v306_v12 = vadd.s32 4294967288, %v301_v11  ;;  %v313_v13 = vadd.s32 4294967280, %v301_v11 }
  0x49   : > { %v334_v19 = vadd.s32 4294967256, %v301_v11  ;;  %v341_v22 = vadd.s32 4294967248, %v301_v11  ;;  %v362_v25 = vadd.s32 4294967224, %v301_v11  ;;  %v397_v40 = vadd.s32 4294967184, %v301_v11  ;;  %p697_p2 = pnand %p696_p0, %p690_p13 }
  0x4a   : > { %256 = vadd.xlane.f32.xlu1 %v238_v14  ;;  %204 = vadd.xlane.f32.xlu0 %v186_v15  ;;  %v320_v14 = vadd.s32 4294967272, %v301_v11 }
  0x4b   : > { %v337_v31 = vsub.s32 %v334_v19, %v889_v1  ;;  %v344_v34 = vsub.s32 %v341_v22, %v889_v1  ;;  %v1005_v37 = vsub.s32 %v362_v25, %v889_v1 }
  0x4c   : > { %v323_v0 = vsub.s32 %v320_v14, %v889_v1 }
  0x4e   : > { %258 = vadd.xlane.f32.xlu1 %v239_v17  ;;  %206 = vadd.xlane.f32.xlu0 %v187_v18  ;;  %v327_v17 = vadd.s32 4294967264, %v301_v11  ;;  %v304_v18 = vsub.s32 %v301_v11, %v889_v1 }
  0x50   : > { %v330_v28 = vsub.s32 %v327_v17, %v889_v1 }
  0x52   : > { %260 = vadd.xlane.f32.xlu1 %v240_v20  ;;  %208 = vadd.xlane.f32.xlu0 %v188_v21  ;;  %v309_v20 = vsub.s32 %v306_v12, %v889_v1  ;;  %v316_v21 = vsub.s32 %v313_v13, %v889_v1 }
  0x56   : > { %262 = vadd.xlane.f32.xlu1 %v241_v23  ;;  %210 = vadd.xlane.f32.xlu0 %v189_v24  ;;  %v348_v23 = vadd.s32 4294967240, %v301_v11  ;;  %v355_v24 = vadd.s32 4294967232, %v301_v11 }
  0x5a   : > { %264 = vadd.xlane.f32.xlu1 %v242_v26  ;;  %212 = vadd.xlane.f32.xlu0 %v190_v27 }
  0x5e   : > { %266 = vadd.xlane.f32.xlu1 %v243_v29  ;;  %214 = vadd.xlane.f32.xlu0 %v191_v30  ;;  %v369_v29 = vadd.s32 4294967216, %v301_v11  ;;  %v376_v30 = vadd.s32 4294967208, %v301_v11 }
  0x62   : > { %268 = vadd.xlane.f32.xlu1 %v244_v32  ;;  %216 = vadd.xlane.f32.xlu0 %v192_v33  ;;  %v383_v32 = vadd.s32 4294967200, %v301_v11  ;;  %v390_v33 = vadd.s32 4294967192, %v301_v11 }
  0x64   : > { %v1025_v49 = vsub.s32 %v390_v33, %v889_v1 }
  0x66   : > { %270 = vadd.xlane.f32.xlu1 %v245_v35  ;;  %218 = vadd.xlane.f32.xlu0 %v193_v36  ;;  %v351_v35 = vsub.s32 %v348_v23, %v889_v1  ;;  %v1002_v36 = vsub.s32 %v355_v24, %v889_v1 }
  0x6a   : > { %272 = vadd.xlane.f32.xlu1 %v246_v38  ;;  %220 = vadd.xlane.f32.xlu0 %v194_v39 }
  0x6e   : > { %274 = vadd.xlane.f32.xlu1 %v247_v41  ;;  %222 = vadd.xlane.f32.xlu0 %v195_v42  ;;  %v404_v41 = vadd.s32 4294967176, %v301_v11 }
  0x70   : > { %v1037_v11 = vsub.s32 %v404_v41, %v889_v1 }
  0x72   : > { %276 = vadd.xlane.f32.xlu1 %v248_v44  ;;  %224 = vadd.xlane.f32.xlu0 %v196_v45  ;;  %v1014_v44 = vsub.s32 %v369_v29, %v889_v1  ;;  %v1017_v45 = vsub.s32 %v376_v30, %v889_v1 }
  0x76   : > { %278 = vadd.xlane.f32.xlu1 %v249_v47  ;;  %226 = vadd.xlane.f32.xlu0 %v197_v48  ;;  %v1022_v48 = vsub.s32 %v383_v32, %v889_v1 }
  0x7a   : > { %280 = vadd.xlane.f32.xlu1 %v250_v50  ;;  %228 = vadd.xlane.f32.xlu0 %v198_v51 }
  0x7e   : > { %282 = vadd.xlane.f32.xlu1 %v251_v53  ;;  %230 = vadd.xlane.f32.xlu0 %v199_v54 }
  0xcf   : > { %v948_v55 = vpop.xlane.xlu1 %252  ;;  %v950_v56 = vpop.xlane.xlu0 %200 }
  0xd0   : > { %v431_v50 = vrot.slane %v948_v55, %v304_v18  ;;  %v305_v51 = vrot.slane %v950_v56, %v304_v18 }
  0xd3   : > { %v952_v57 = vpop.xlane.xlu1 %254  ;;  %v954_v58 = vpop.xlane.xlu0 %202 }
  0xd4   : > { %v435_v42 = vrot.slane %v952_v57, %v309_v20  ;;  %v310_v43 = vrot.slane %v954_v58, %v309_v20 }
  0xd6   : > { %v436_v55 = vsel %vm311_vm0, %v435_v42, %v431_v50  ;;  %v312_v56 = vsel %vm311_vm0, %v310_v43, %v305_v51 }
  0xd7   : > { %v956_v59 = vpop.xlane.xlu1 %256  ;;  %v958_v60 = vpop.xlane.xlu0 %204 }
  0xd8   : > { %v440_v46 = vrot.slane %v956_v59, %v316_v21  ;;  %v317_v47 = vrot.slane %v958_v60, %v316_v21  ;;  %v1034_v60 = vsub.s32 %v397_v40, %v889_v1 }
  0xdb   : > { %v960_v61 = vpop.xlane.xlu1 %258  ;;  %v962_v62 = vpop.xlane.xlu0 %206 }
  0xdc   : > { %v445_v52 = vrot.slane %v960_v61, %v323_v0  ;;  %v324_v53 = vrot.slane %v962_v62, %v323_v0 }
  0xdf   : > { %v964_v63 = vpop.xlane.xlu1 %260  ;;  %v966_v2 = vpop.xlane.xlu0 %208 }
  0xe0   : > { %v450_v54 = vrot.slane %v964_v63, %v330_v28  ;;  %v331_v57 = vrot.slane %v966_v2, %v330_v28  ;;  %v441_v63 = vsel %vm318_vm1, %v440_v46, %v436_v55  ;;  %v319_v2 = vsel %vm318_vm1, %v317_v47, %v312_v56 }
  0xe1   : > { %v446_v1 = vsel %vm325_vm2, %v445_v52, %v441_v63  ;;  %v326_v14 = vsel %vm325_vm2, %v324_v53, %v319_v2 }
  0xe2   : > { %v333_v18 = vsel %vm332_vm3, %v331_v57, %v326_v14 }
  0xe3   : > { %v968_v3 = vpop.xlane.xlu1 %262  ;;  %v970_v4 = vpop.xlane.xlu0 %210 }
  0xe4   : > { %v455_v61 = vrot.slane %v968_v3, %v337_v31  ;;  %v338_v62 = vrot.slane %v970_v4, %v337_v31  ;;  %v451_v4 = vsel %vm332_vm3, %v450_v54, %v446_v1 }
  0xe6   : > { %v456_v21 = vsel %vm339_vm4, %v455_v61, %v451_v4  ;;  %v340_v22 = vsel %vm339_vm4, %v338_v62, %v333_v18 }
  0xe7   : > { %v972_v5 = vpop.xlane.xlu1 %264  ;;  %v974_v6 = vpop.xlane.xlu0 %212 }
  0xe8   : > { %v460_v12 = vrot.slane %v972_v5, %v344_v34  ;;  %v345_v13 = vrot.slane %v974_v6, %v344_v34 }
  0xea   : > { %v461_v23 = vsel %vm346_vm5, %v460_v12, %v456_v21  ;;  %v347_v0 = vsel %vm346_vm5, %v345_v13, %v340_v22 }
  0xeb   : > { %v976_v7 = vpop.xlane.xlu1 %266  ;;  %v978_v8 = vpop.xlane.xlu0 %214 }
  0xec   : > { %v465_v17 = vrot.slane %v976_v7, %v351_v35  ;;  %v352_v3 = vrot.slane %v978_v8, %v351_v35 }
  0xee   : > { %v466_v24 = vsel %vm353_vm6, %v465_v17, %v461_v23  ;;  %v354_v25 = vsel %vm353_vm6, %v352_v3, %v347_v0 }
  0xef   : > { %v980_v9 = vpop.xlane.xlu1 %268  ;;  %v982_v10 = vpop.xlane.xlu0 %216 }
  0xf0   : > { %v470_v19 = vrot.slane %v980_v9, %v1002_v36  ;;  %v359_v5 = vrot.slane %v982_v10, %v1002_v36 }
  0xf2   : > { %v471_v28 = vsel %vm360_vm7, %v470_v19, %v466_v24  ;;  %v361_v29 = vsel %vm360_vm7, %v359_v5, %v354_v25 }
  0xf3   : > { %v985_v15 = vpop.xlane.xlu1 %270  ;;  %v987_v16 = vpop.xlane.xlu0 %218 }
  0xf4   : > { %v475_v7 = vrot.slane %v985_v15, %v1005_v37  ;;  %v366_v8 = vrot.slane %v987_v16, %v1005_v37 }
  0xf6   : > { %v476_v32 = vsel %vm367_vm8, %v475_v7, %v471_v28  ;;  %v368_v33 = vsel %vm367_vm8, %v366_v8, %v361_v29 }
  0xf7   : > { %v993_v26 = vpop.xlane.xlu1 %272  ;;  %v995_v27 = vpop.xlane.xlu0 %220 }
  0xf8   : > { %v480_v9 = vrot.slane %v993_v26, %v1014_v44  ;;  %v373_v10 = vrot.slane %v995_v27, %v1014_v44 }
  0xfa   : > { %v481_v36 = vsel %vm374_vm9, %v480_v9, %v476_v32  ;;  %v375_v37 = vsel %vm374_vm9, %v373_v10, %v368_v33 }
  0xfb   : > { %v1007_v38 = vpop.xlane.xlu1 %274  ;;  %v1009_v39 = vpop.xlane.xlu0 %222 }
  0xfc   : > { %v485_v15 = vrot.slane %v1007_v38, %v1017_v45  ;;  %v380_v16 = vrot.slane %v1009_v39, %v1017_v45 }
  0xfe   : > { %v486_v40 = vsel %vm381_vm10, %v485_v15, %v481_v36  ;;  %v382_v41 = vsel %vm381_vm10, %v380_v16, %v375_v37 }
  0xff   : > { %v277_v58 = vpop.xlane.xlu1 %276  ;;  %v225_v59 = vpop.xlane.xlu0 %224 }
 0x100   : > { %v490_v26 = vrot.slane %v277_v58, %v1022_v48  ;;  %v387_v30 = vrot.slane %v225_v59, %v1022_v48 }
 0x102   : > { %v491_v42 = vsel %vm388_vm11, %v490_v26, %v486_v40  ;;  %v389_v43 = vsel %vm388_vm11, %v387_v30, %v382_v41 }
 0x103   : > { %v279_v6 = vpop.xlane.xlu1 %278  ;;  %v227_v20 = vpop.xlane.xlu0 %226 }
 0x104   : > { %v495_v34 = vrot.slane %v279_v6, %v1025_v49  ;;  %v394_v35 = vrot.slane %v227_v20, %v1025_v49 }
 0x106   : > { %v496_v46 = vsel %vm395_vm12, %v495_v34, %v491_v42  ;;  %v396_v47 = vsel %vm395_vm12, %v394_v35, %v389_v43 }
 0x107   : > { %v281_v27 = vpop.xlane.xlu1 %280  ;;  %v229_v31 = vpop.xlane.xlu0 %228 }
 0x108   : > { %v500_v38 = vrot.slane %v281_v27, %v1034_v60  ;;  %v401_v39 = vrot.slane %v229_v31, %v1034_v60 }
 0x10a   : > { %v501_v50 = vsel %vm402_vm13, %v500_v38, %v496_v46  ;;  %v403_v51 = vsel %vm402_vm13, %v401_v39, %v396_v47 }
 0x10b   : > { %v283_v44 = vpop.xlane.xlu1 %282  ;;  %v231_v45 = vpop.xlane.xlu0 %230 }
 0x10c   : > { %v505_v48 = vrot.slane %v283_v44, %v1037_v11  ;;  %v408_v49 = vrot.slane %v231_v45, %v1037_v11 }
 0x10e   : > { %v506_v52 = vsel %vm409_vm14, %v505_v48, %v501_v50  ;;  %v410_v53 = vsel %vm409_vm14, %v408_v49, %v403_v51 }
 0x10f   : > { %v509_v54 = vsel %vm508_vm15, %v410_v53, %v506_v52 }
 0x110   : > { %510 = vst [vmem:[%s161_s4] sm:$0x3] %v509_v54 }
 0x111   : > { %700 = shalt.err (!%p697_p2)
}
 0x112   : > { %s701_s25 = scalar_lea.hbm %s1100_s16, 32  ;;  %s705_s29 = scalar_lea.hbm %s1146_s2, 64 }
 0x113   : > { %p702_p4 = scmp.ne.s32.totalorder %s1100_s16, %s701_s25  ;;  %p706_p9 = scmp.lt.u32.totalorder %s1100_s16, %s1146_s2 }
 0x114   : > { %p707_p1 = scmp.lt.u32.totalorder %s705_s29, %s701_s25  ;;  %p709_p6 = scmp.lt.u32.totalorder %s701_s25, %s1100_s16 }
 0x115   : > { %p703_p5 = pnand %p702_p4, %p1153_p11 }
 0x116   : > { %p708_p3 = por %p707_p1, %p706_p9 }
 0x117   : > { %p704_p7 = pneg %p703_p5 }
 0x118   : > { %p710_p12 = por %p709_p6, %p708_p3 }
 0x11a   : > { %p711_p13 = pnand %p710_p12, %p704_p7 }
 0x11c   : > { %714 = shalt.err (!%p711_p13)
}
 0x11d   : > { %611 = dma.vmem_to_hbm [thread:$0]  (%p1153_p11), %s1102_s7, 32, %s1100_s16, %s512_s13  }
 0x11e PF: > { %s537_s28 = sand.u32 1, %s741_s9   ;;  %p1154_p8 = scmp.ne.s32.totalorder %s1151_s22, 0 }
 0x11f   : > { %p1155_p10 = scmp.ge.s32.totalorder %s753_s12, 2  ;;  %s538_s30 = scalar_lea.sflag [#allocation4], %s537_s28 }
 0x121   : > { %p618_p0 = pnand %p1155_p10, %p1154_p8 }
 0x123   : > { %736 = dma.done.wait (!%p618_p0), %s538_s30, 32  }
 0x124   : > { %738 = vsyncadd (!%p618_p0), %s538_s30, 4294967264  ;;  %p15_p2 = scmp.ge.s32.totalorder %s799_s15, 4   ;;  %s1156_s9 = smov %s745_s10 }
 0x125   : > { %s1157_s10 = smov %s749_s11  ;;  %s1158_s11 = smov %s811_s18 }
 0x126   : > { %s1159_s12 = smov %s799_s15  ;;  %17 = sbr.rel (!%p15_p2) target bundleno = 5 (0x5), region = 73 }
 0x12d   :  { %543 = vsyncpa [#allocation3], 1 }
 0x12e   :  { %545 = vsyncpa [#allocation3 + $0x1], 1 }
 0x12f   :  { %546 = vsyncpa [#allocation4], 1 }
 0x130   :  { %548 = vsyncpa [#allocation4 + $0x1], 1 }

</bundles_post_ra>
